<compile_context>
chip_gen: v7x
topology: tpu7x:2x2x1
jax: 0.10.0
libtpu: 0.0.40
codegen_flags: <defaults>
</compile_context>

<pallas_src>
import functools

import jax
import jax.numpy as jnp
from jax.experimental import pallas as pl
from jax.experimental.pallas import tpu as pltpu


def _phase_gemm_kernel(p_ref, w_ref, shift_ref, o_ref):
    """One grid step = one group of output phases; pure GEMM + BN shift + ReLU.

    p_ref:     (PPS, Ktot, L)    im2col patches (bf16/f32), lane-dense L
    w_ref:     (PPS, Cout, Ktot) per-phase GEMM weights with BN scale folded in
    shift_ref: (Cout, 1)         folded BN shift (f32)
    o_ref:     (PPS, Cout, L)    per-phase outputs (f32), lane-dense stores
    """
    pps, cout, lanes = o_ref.shape
    # Hoist the lane broadcast above the phase loop (JAX does not CSE it).
    shift = jnp.broadcast_to(shift_ref[...], (cout, lanes))
    for q in range(pps):   # static unroll; pps = s*s / #grid_steps (tiny)
        acc = jnp.dot(w_ref[q], p_ref[q], preferred_element_type=jnp.float32)
        o_ref[q] = jnp.maximum(acc + shift, 0.0)


def conv_transpose2d_bn_relu(x_nchw, w_pt, gamma, beta, running_mean,
                             running_var, *, stride, padding, eps=1e-5,
                             compute_dtype=jnp.bfloat16):
    """ConvTranspose2d(bias=False) -> BatchNorm2d(eval) -> ReLU.

    x_nchw: (N, Cin, H, W) float32
    w_pt:   (Cin, Cout, K, K)  PyTorch ConvTranspose2d weight layout
    """
    N, Cin, H, W = x_nchw.shape
    Cin_w, Cout, K, Kw = w_pt.shape
    assert Cin == Cin_w and K == Kw
    s = int(stride)

    Ho = (H - 1) * s - 2 * padding + K
    Wo = (W - 1) * s - 2 * padding + K
    assert Ho > 0 and Wo > 0

    # ---- static phase bookkeeping (from the definition:
    #      y[s*i + r] = sum_t x[i + d_r - t] * w[k0_r + s*t]) ----
    k0 = [(r + padding) % s for r in range(s)]
    d = [(r + padding) // s for r in range(s)]
    T = [((K - 1 - k0[r]) // s + 1) if k0[r] <= K - 1 else 0 for r in range(s)]
    Tm = max(1, max(T))                       # taps per phase (zero-padded)
    Hph = -(-Ho // s)                         # ceil(Ho / s)
    Wph = -(-Wo // s)
    pad_lo = max(0, (Tm - 1) - (padding // s))
    pad_hi_h = max(0, (Hph - 1) + max(d) - (H - 1))
    pad_hi_w = max(0, (Wph - 1) + max(d) - (W - 1))
    base = tuple(d[r] + pad_lo for r in range(s))
    Ktot = Tm * Tm * Cin

    L = N * Hph * Wph                         # batch folded into the lane axis
    L_pad = -(-L // 128) * 128                # keep stores unmasked (lane-dense)

    # ---- wrapper-side im2col (plain JAX): all relayouts stay out of the kernel
    xp = jnp.pad(x_nchw.astype(jnp.float32),
                 ((0, 0), (0, 0), (pad_lo, pad_hi_h), (pad_lo, pad_hi_w)))
    phase_patches = []
    for r in range(s):
        for c in range(s):
            slabs = []
            for tt in range(Tm):
                ro = base[r] - tt
                for uu in range(Tm):
                    co = base[c] - uu
                    slab = xp[:, :, ro:ro + Hph, co:co + Wph]  # (N,Cin,Hph,Wph)
                    slabs.append(
                        jnp.transpose(slab, (1, 0, 2, 3)).reshape(Cin, L))
            phase_patches.append(jnp.concatenate(slabs, axis=0))  # (Ktot, L)
    patches = jnp.stack(phase_patches, axis=0)                    # (s*s,Ktot,L)
    if L_pad != L:
        patches = jnp.pad(patches, ((0, 0), (0, 0), (0, L_pad - L)))
    patches = patches.astype(compute_dtype)

    # ---- per-phase GEMM weights with the BN scale folded in ----
    scale_vec = gamma / jnp.sqrt(running_var + eps)
    shift_vec = beta - running_mean * scale_vec
    w_t = jnp.transpose(w_pt, (2, 3, 0, 1)).astype(jnp.float32)   # (K,K,Cin,Cout)
    phase_ws = []
    for r in range(s):
        for c in range(s):
            sub = w_t[k0[r]::s, k0[c]::s]                         # (T_r,T_c,Cin,Cout)
            sub = jnp.pad(sub, ((0, Tm - sub.shape[0]),
                                (0, Tm - sub.shape[1]), (0, 0), (0, 0)))
            phase_ws.append(
                jnp.transpose(sub, (3, 0, 1, 2)).reshape(Cout, Ktot))
    w2 = jnp.stack(phase_ws, axis=0) * scale_vec[None, :, None]   # fold BN scale
    w2 = w2.astype(compute_dtype)                                 # (s*s,Cout,Ktot)
    shift = shift_vec.reshape(Cout, 1).astype(jnp.float32)

    # ---- grid: phase groups. Two "parallel" steps when s*s is even (one per
    #      v7x TensorCore); a single step otherwise (no serial loop on v5e/v6e).
    n_ph = s * s
    G = 2 if (n_ph % 2 == 0 and n_ph >= 2) else 1
    PPS = n_ph // G

    out_ph = pl.pallas_call(
        _phase_gemm_kernel,
        out_shape=jax.ShapeDtypeStruct((n_ph, Cout, L_pad), jnp.float32),
        grid_spec=pltpu.PrefetchScalarGridSpec(
            num_scalar_prefetch=0,
            grid=(G,),
            in_specs=[
                pl.BlockSpec((PPS, Ktot, L_pad), lambda g: (g, 0, 0)),
                pl.BlockSpec((PPS, Cout, Ktot), lambda g: (g, 0, 0)),
                pl.BlockSpec((Cout, 1), lambda g: (0, 0)),
            ],
            out_specs=pl.BlockSpec((PPS, Cout, L_pad), lambda g: (g, 0, 0)),
        ),
        compiler_params=pltpu.CompilerParams(
            dimension_semantics=("parallel",)),
    )(patches, w2, shift)

    # ---- interleave the s*s phases back into (N, Cout, Ho, Wo) (layout glue)
    out = out_ph[:, :, :L].reshape(s, s, Cout, N, Hph, Wph)
    out = jnp.transpose(out, (3, 2, 4, 0, 5, 1))          # (N,Cout,Hph,s,Wph,s)
    out = out.reshape(N, Cout, s * Hph, s * Wph)[:, :, :Ho, :Wo]
    return out


def _reference(x_nchw, w_pt, gamma, beta, running_mean, running_var,
               *, stride, padding, eps=1e-5):
    """Pure-JAX reference using lax.conv_general_dilated (lhs_dilation)."""
    N, Cin, H, W = x_nchw.shape
    _, Cout, K, _ = w_pt.shape
    w_flip = jnp.transpose(w_pt[:, :, ::-1, ::-1], (1, 0, 2, 3))  # (Cout,Cin,K,K)
    p = K - 1 - padding
    y = jax.lax.conv_general_dilated(
        x_nchw, w_flip,
        window_strides=(1, 1),
        padding=((p, p), (p, p)),
        lhs_dilation=(stride, stride),
        dimension_numbers=("NCHW", "OIHW", "NCHW"))
    scale = (gamma / jnp.sqrt(running_var + eps)).reshape(1, Cout, 1, 1)
    shift = (beta - running_mean * gamma / jnp.sqrt(running_var + eps)).reshape(
        1, Cout, 1, 1)
    return jnp.maximum(y * scale + shift, 0.0)


if __name__ == "__main__":
    # Module config: ConvTranspose2D(in=4, out=8, kernel_size=4, stride=2,
    #                                padding=1, activation=nn.ReLU())
    N, Cin, H, W = 2, 4, 16, 16
    Cout, K, stride, padding = 8, 4, 2, 1

    key = jax.random.PRNGKey(0)
    kx, kw, kg, kb = jax.random.split(key, 4)
    x = jax.random.normal(kx, (N, Cin, H, W), dtype=jnp.float32)
    # PyTorch ConvTranspose2d weight shape: (in_channels, out_channels, kH, kW)
    w_pt = jax.random.normal(kw, (Cin, Cout, K, K), dtype=jnp.float32) * 0.1
    gamma = jax.random.normal(kg, (Cout,), dtype=jnp.float32) * 0.1 + 1.0
    beta = jax.random.normal(kb, (Cout,), dtype=jnp.float32) * 0.1
    running_mean = jnp.zeros((Cout,), jnp.float32)
    running_var = jnp.ones((Cout,), jnp.float32)

    ref = _reference(x, w_pt, gamma, beta, running_mean, running_var,
                     stride=stride, padding=padding)

    # Exact-path validation (f32 MXU operands) against the pure-JAX reference.
    fwd_f32 = jax.jit(functools.partial(
        conv_transpose2d_bn_relu, stride=stride, padding=padding,
        compute_dtype=jnp.float32))
    out_f32 = jax.block_until_ready(
        fwd_f32(x, w_pt, gamma, beta, running_mean, running_var))

    # Default fast path: bf16 MXU operands, f32 accumulation + f32 epilogue.
    fwd = jax.jit(functools.partial(
        conv_transpose2d_bn_relu, stride=stride, padding=padding))
    out = jax.block_until_ready(
        fwd(x, w_pt, gamma, beta, running_mean, running_var))

    Ho = (H - 1) * stride - 2 * padding + K
    Wo = (W - 1) * stride - 2 * padding + K
    assert out.shape == (N, Cout, Ho, Wo), out.shape
    assert jnp.allclose(out_f32, ref, atol=2e-4, rtol=2e-4), float(
        jnp.max(jnp.abs(out_f32 - ref)))
    # bf16 inputs to the MXU: allow bf16-level rounding vs the f32 reference.
    assert jnp.allclose(out, ref, atol=3e-2, rtol=3e-2), float(
        jnp.max(jnp.abs(out - ref)))

    print("KERNEL_OK")
</pallas_src>

<mosaic_0001>
module attributes {stable_mosaic.version = 11 : i64} {
  func.func @_phase_gemm_kernel(%arg0: i32, %arg1: memref<2x16x512xf32, #tpu.memory_space<vmem>>, %arg2: memref<2x8x16xf32, #tpu.memory_space<vmem>>, %arg3: memref<8x1xf32, #tpu.memory_space<vmem>>, %arg4: memref<2x8x512xf32, #tpu.memory_space<vmem>>) attributes {dimension_semantics = [#tpu.dimension_semantics<parallel>], iteration_bounds = array<i64: 2>, scalar_prefetch = 0 : i64, scratch_operands = 0 : i64, tpu.core_type = #tpu.core_type<tc>, window_params = [{transform_indices = @transform_0, window_bounds = array<i64: 2, 16, 512>}, {transform_indices = @transform_1, window_bounds = array<i64: 2, 8, 16>}, {pipeline_mode = #tpu.pipeline_mode<synchronous>, transform_indices = @transform_2, window_bounds = array<i64: 8, 1>}, {transform_indices = @transform_3, window_bounds = array<i64: 2, 8, 512>}]} {
    %c0 = arith.constant 0 : index
    %c0_0 = arith.constant 0 : index
    %0 = vector.load %arg3[%c0, %c0_0] : memref<8x1xf32, #tpu.memory_space<vmem>>, vector<8x1xf32>
    %1 = vector.shape_cast %0 : vector<8x1xf32> to vector<8x1xf32>
    %2 = vector.broadcast %1 : vector<8x1xf32> to vector<8x512xf32>
    %c0_1 = arith.constant 0 : index
    %c0_2 = arith.constant 0 : index
    %c0_3 = arith.constant 0 : index
    %3 = vector.load %arg2[%c0_1, %c0_2, %c0_3] : memref<2x8x16xf32, #tpu.memory_space<vmem>>, vector<1x8x16xf32>
    %4 = vector.shape_cast %3 : vector<1x8x16xf32> to vector<8x16xf32>
    %c0_4 = arith.constant 0 : index
    %c0_5 = arith.constant 0 : index
    %c0_6 = arith.constant 0 : index
    %5 = vector.load %arg1[%c0_4, %c0_5, %c0_6] : memref<2x16x512xf32, #tpu.memory_space<vmem>>, vector<1x16x512xf32>
    %6 = vector.shape_cast %5 : vector<1x16x512xf32> to vector<16x512xf32>
    %cst = arith.constant dense<0.000000e+00> : vector<8x512xf32>
    %7 = tpu.matmul %4, %6, %cst {dimension_numbers = #tpu.dot_dimension_numbers<[1], [0], [0], [1], [0, 0, 1, 1], [], []>} : vector<8x16xf32>, vector<16x512xf32>, vector<8x512xf32> -> vector<8x512xf32>
    %8 = arith.addf %7, %2 : vector<8x512xf32>
    %cst_7 = arith.constant 0.000000e+00 : f32
    %9 = vector.broadcast %cst_7 : f32 to vector<8x512xf32>
    %10 = arith.maximumf %8, %9 : vector<8x512xf32>
    %c0_8 = arith.constant 0 : index
    %c0_9 = arith.constant 0 : index
    %c0_10 = arith.constant 0 : index
    %11 = vector.load %arg4[%c0_8, %c0_9, %c0_10] : memref<2x8x512xf32, #tpu.memory_space<vmem>>, vector<1x8x512xf32>
    %12 = vector.shape_cast %11 : vector<1x8x512xf32> to vector<8x512xf32>
    %13 = vector.shape_cast %10 : vector<8x512xf32> to vector<1x8x512xf32>
    tpu.vector_store %arg4[%c0_8, %c0_9, %c0_10], %13 {strides = array<i32>} : memref<2x8x512xf32, #tpu.memory_space<vmem>>, vector<1x8x512xf32>,
    %c1 = arith.constant 1 : index
    %c0_11 = arith.constant 0 : index
    %c0_12 = arith.constant 0 : index
    %14 = vector.load %arg2[%c1, %c0_11, %c0_12] : memref<2x8x16xf32, #tpu.memory_space<vmem>>, vector<1x8x16xf32>
    %15 = vector.shape_cast %14 : vector<1x8x16xf32> to vector<8x16xf32>
    %c1_13 = arith.constant 1 : index
    %c0_14 = arith.constant 0 : index
    %c0_15 = arith.constant 0 : index
    %16 = vector.load %arg1[%c1_13, %c0_14, %c0_15] : memref<2x16x512xf32, #tpu.memory_space<vmem>>, vector<1x16x512xf32>
    %17 = vector.shape_cast %16 : vector<1x16x512xf32> to vector<16x512xf32>
    %cst_16 = arith.constant dense<0.000000e+00> : vector<8x512xf32>
    %18 = tpu.matmul %15, %17, %cst_16 {dimension_numbers = #tpu.dot_dimension_numbers<[1], [0], [0], [1], [0, 0, 1, 1], [], []>} : vector<8x16xf32>, vector<16x512xf32>, vector<8x512xf32> -> vector<8x512xf32>
    %19 = arith.addf %18, %2 : vector<8x512xf32>
    %cst_17 = arith.constant 0.000000e+00 : f32
    %20 = vector.broadcast %cst_17 : f32 to vector<8x512xf32>
    %21 = arith.maximumf %19, %20 : vector<8x512xf32>
    %c1_18 = arith.constant 1 : index
    %c0_19 = arith.constant 0 : index
    %c0_20 = arith.constant 0 : index
    %22 = vector.load %arg4[%c1_18, %c0_19, %c0_20] : memref<2x8x512xf32, #tpu.memory_space<vmem>>, vector<1x8x512xf32>
    %23 = vector.shape_cast %22 : vector<1x8x512xf32> to vector<8x512xf32>
    %24 = vector.shape_cast %21 : vector<8x512xf32> to vector<1x8x512xf32>
    tpu.vector_store %arg4[%c1_18, %c0_19, %c0_20], %24 {strides = array<i32>} : memref<2x8x512xf32, #tpu.memory_space<vmem>>, vector<1x8x512xf32>,
    return
  }
  func.func @transform_0(%arg0: i32) -> (i32, i32, i32) {
    %c0_i32 = arith.constant 0 : i32
    %c0_i32_0 = arith.constant 0 : i32
    %c0_i32_1 = arith.constant 0 : i32
    return %arg0, %c0_i32, %c0_i32_0 : i32, i32, i32
  }
  func.func @transform_1(%arg0: i32) -> (i32, i32, i32) {
    %c0_i32 = arith.constant 0 : i32
    %c0_i32_0 = arith.constant 0 : i32
    %c0_i32_1 = arith.constant 0 : i32
    return %arg0, %c0_i32, %c0_i32_0 : i32, i32, i32
  }
  func.func @transform_2(%arg0: i32) -> (i32, i32) {
    %c0_i32 = arith.constant 0 : i32
    %c0_i32_0 = arith.constant 0 : i32
    %c0_i32_1 = arith.constant 0 : i32
    return %c0_i32, %c0_i32_0 : i32, i32
  }
  func.func @transform_3(%arg0: i32) -> (i32, i32, i32) {
    %c0_i32 = arith.constant 0 : i32
    %c0_i32_0 = arith.constant 0 : i32
    %c0_i32_1 = arith.constant 0 : i32
    return %arg0, %c0_i32, %c0_i32_0 : i32, i32, i32
  }
}

</mosaic_0001>

<bundles_post_ra>
// kernel: conv_transpose2d_bn_relu.1
= control target key start
LH: loop header
LB: loop body
LE: loop exit
PB: predicated region body
PF: predicated region fallthrough
CT: control target
= control target key end

     0   :  { %s696_s12 = smov 0   ;;  %s732_s0 = inlined_call_operand.vmem [shape: f32[4,16,512], index: 0, kind: input, shape index: {}]   ;;  %s733_s1 = inlined_call_operand.vmem [shape: f32[4,8,16], index: 1, kind: input, shape index: {}]   ;;  %s734_s2 = inlined_call_operand.vmem [shape: f32[8,1], index: 2, kind: input, shape index: {}]   ;;  %s735_s3 = inlined_call_operand.vmem [shape: f32[4,8,512], index: 3, kind: output, shape index: {}]  }
   0x1 LB: > { %s605_s13 = sadd.s32 4294967295, %s672_s12   ;;  %p609_p0 = scmp.ge.s32.totalorder %s672_s12, 1  ;;  %s672_s12 = sphi %s696_s12, %s13_s12  }
   0x2   : > { %p150_p1 = scmp.lt.s32.totalorder %s672_s12, 3 }
   0x4   : > { %p151_p2 = pnand %p609_p0, %p150_p1 }
   0x5   : > { %s610_s14 = sshll.u32 (!%p151_p2), %s605_s13, 1  ;;  %v201_v0 = vld [vmem:[%s734_s2] sm:$0xff] (!%p151_p2)  ;;  %v674_v1 = vmov (!%p151_p2), 0.0   ;;  %v675_v2 = vmov (!%p151_p2), 0   ;;  %vm216_vm0 = vcmask (!%p151_p2), 130048  }
   0x6   : > { %154 = sbr.rel (%p151_p2) target bundleno = 247 (0xf7), region = 32  ;;  %p182_p3 = scmp.lt.s32.totalorder (!%p151_p2), %s610_s14, 3  ;;  %284 = vmatprep.mubr.f32.mxu0 (!%p151_p2), %v674_v1  ;;  %355 = vmatprep.mubr.f32.mxu1 (!%p151_p2), %v674_v1 }
   0x7   : > { %665 = vset.pattern.permute.xlu0 (!%p151_p2), %v675_v2 }
   0x8   : > { %204 = vperm.xlu0 (!%p151_p2), %665, %v201_v0  }
   0xd   : > { %s737_s14 = smov (!%p182_p3, %s610_s14), 3 }
   0xe   : > { %s637_s17 = sshll.u32 %s737_s14, 6  ;;  %s614_s18 = sshll.u32 %s737_s14, 3 }
   0xf   : > { %s186_s21 = scalar_lea.vmem %s732_s0, %s637_s17  ;;  %s717_s24 = scalar_lea.vmem %s733_s1, %s614_s18 }
  0x10   : > { %v209_v3 = vld [vmem:[%s186_s21 + $0x8] sm:$0xff]  ;;  %v211_v5 = vld [vmem:[%s186_s21 + $0x18] sm:$0xff]  ;;  %v208_v8 = vld [vmem:[%s186_s21] sm:$0xff]  ;;  %s638_s25 = sshll.u32 %s737_s14, 5 }
  0x11   : > { %v213_v4 = vld [vmem:[%s186_s21 + $0x28] sm:$0xff]  ;;  %v215_v7 = vld [vmem:[%s186_s21 + $0x38] sm:$0xff]  ;;  %v212_v9 = vld [vmem:[%s186_s21 + $0x20] sm:$0xff]  ;;  %s199_s28 = scalar_lea.vmem %s735_s3, %s638_s25 }
  0x12   : > { %v639_v6 = vpack.c.bf16 %v213_v4, %v209_v3  ;;  %v643_v10 = vpack.c.bf16 %v215_v7, %v211_v5  ;;  %v641_v11 = vpack.c.bf16 %v212_v9, %v208_v8  ;;  %v210_v12 = vld [vmem:[%s186_s21 + $0x10] sm:$0xff]  ;;  %v207_v15 = vld [vmem:[%s717_s24] sm:$0xff]  ;;  %v622_v16 = vld [vmem:[%s186_s21 + $0x48] sm:$0xff] }
  0x13   : > { %v214_v13 = vld [vmem:[%s186_s21 + $0x30] sm:$0xff]  ;;  %v626_v17 = vld [vmem:[%s186_s21 + $0x68] sm:$0xff]  ;;  %v624_v19 = vld [vmem:[%s186_s21 + $0x58] sm:$0xff] }
  0x14   : > { %640 = vmatprep.subr.bf16.mxu0 %v639_v6  ;;  %v645_v14 = vpack.c.bf16 %v214_v13, %v210_v12  ;;  %644 = vmatprep.subr.bf16.mxu1 %v643_v10  ;;  %v647_v18 = vpack.c.bf16 %v626_v17, %v622_v16  ;;  %v628_v20 = vld [vmem:[%s186_s21 + $0x78] sm:$0xff]  ;;  %v621_v21 = vld [vmem:[%s186_s21 + $0x40] sm:$0xff]  ;;  %v623_v24 = vld [vmem:[%s186_s21 + $0x50] sm:$0xff] }
  0x15   : > { %642 = vmatpush1.bf16.msra.mxu0 %v641_v11  ;;  %v651_v22 = vpack.c.bf16 %v628_v20, %v624_v19  ;;  %v625_v23 = vld [vmem:[%s186_s21 + $0x60] sm:$0xff]  ;;  %v627_v25 = vld [vmem:[%s186_s21 + $0x70] sm:$0xff]  ;;  %v620_v28 = vld [vmem:[%s717_s24 + $0x8] sm:$0xff] }
  0x16   : > { %646 = vmatpush1.bf16.msra.mxu1 %v645_v14  ;;  %648 = vmatprep.subr.bf16.mxu0 %v647_v18  ;;  %v649_v26 = vpack.c.bf16 %v625_v23, %v621_v21  ;;  %v653_v27 = vpack.c.bf16 %v627_v25, %v623_v24 }
  0x17   : > { %652 = vmatprep.subr.bf16.mxu1 %v651_v22 }
  0x18   : > { %618 = vmatmul.mubr.msk.f32.vlgmr.msra.gmra.mrb[0].mxu0 %vm216_vm0, %v207_v15 }
  0x19   : > { %619 = vmatmul.mubr.msk.f32.vlgmr.msra.gmra.mrb[0].mxu1 %vm216_vm0, %v207_v15  ;;  %650 = vmatpush1.bf16.msra.mxu0 %v649_v26 }
  0x1a   : > { %654 = vmatpush1.bf16.msra.mxu1 %v653_v27  ;;  %448 = vmatprep.mubr.f32.mxu0 %v674_v1 }
  0x1b   : > { %519 = vmatprep.mubr.f32.mxu1 %v674_v1 }
  0x1c   : > { %629 = vmatmul.mubr.msk.f32.vlgmr.msra.gmra.mrb[2].mxu0 %vm216_vm0, %v620_v28 }
  0x1d   : > { %630 = vmatmul.mubr.msk.f32.vlgmr.msra.gmra.mrb[2].mxu1 %vm216_vm0, %v620_v28 }
  0x87   : > { %v205_v29 = vpop.permute.xlu0 %204 }
  0xeb   : > { %v286_v30 = vpop.f32.mrb[0].mxu0 }
  0xec   : > { %v357_v31 = vpop.f32.mrb[0].mxu1  ;;  %v288_v32 = vpop.f32.mrb[1].mxu0  ;;  %v287_v33 = vadd.f32 %v286_v30, %v205_v29 }
  0xed   : > { %v289_v34 = vadd.f32 %v288_v32, %v205_v29  ;;  %v359_v35 = vpop.f32.mrb[1].mxu1  ;;  %v358_v36 = vadd.f32 %v357_v31, %v205_v29 }
  0xee   : > { %v360_v37 = vadd.f32 %v359_v35, %v205_v29  ;;  %v362_v38 = vmax.f32 %v287_v33, 0.0 }
  0xef   : > { %v363_v39 = vmax.f32 %v289_v34, 0.0  ;;  %v450_v40 = vpop.f32.mrb[2].mxu0  ;;  %v364_v41 = vmax.f32 %v358_v36, 0.0 }
  0xf0   : > { %v365_v42 = vmax.f32 %v360_v37, 0.0  ;;  %366 = vst [vmem:[%s199_s28] sm:$0xff] %v362_v38  ;;  %v451_v43 = vadd.f32 %v450_v40, %v205_v29  ;;  %v521_v44 = vpop.f32.mrb[2].mxu1  ;;  %v452_v45 = vpop.f32.mrb[3].mxu0 }
  0xf1   : > { %367 = vst [vmem:[%s199_s28 + $0x8] sm:$0xff] %v363_v39  ;;  %368 = vst [vmem:[%s199_s28 + $0x10] sm:$0xff] %v364_v41  ;;  %v522_v46 = vadd.f32 %v521_v44, %v205_v29  ;;  %v453_v47 = vadd.f32 %v452_v45, %v205_v29  ;;  %v523_v48 = vpop.f32.mrb[3].mxu1 }
  0xf2   : > { %369 = vst [vmem:[%s199_s28 + $0x18] sm:$0xff] %v365_v42  ;;  %v526_v49 = vmax.f32 %v451_v43, 0.0  ;;  %v524_v50 = vadd.f32 %v523_v48, %v205_v29 }
  0xf3   : > { %v528_v51 = vmax.f32 %v522_v46, 0.0  ;;  %v527_v52 = vmax.f32 %v453_v47, 0.0 }
  0xf4   : > { %631 = vst [vmem:[%s199_s28 + $0x20] sm:$0xff] %v526_v49  ;;  %v529_v53 = vmax.f32 %v524_v50, 0.0 }
  0xf5   : > { %633 = vst [vmem:[%s199_s28 + $0x30] sm:$0xff] %v528_v51  ;;  %632 = vst [vmem:[%s199_s28 + $0x28] sm:$0xff] %v527_v52 }
  0xf6   : > { %634 = vst [vmem:[%s199_s28 + $0x38] sm:$0xff] %v529_v53 }
  0xf7 PF: > { %s13_s12 = sadd.s32 1, %s672_s12  }
  0xf8   : > { %p10_p4 = scmp.ge.s32.totalorder %s13_s12, 4  }
  0xfa   :  { %12 = sbr.rel (!%p10_p4) target bundleno = 1 (0x1), region = 68 }

</bundles_post_ra>
